<compile_context>
chip_gen: v6e
topology: v6e:2x2x1
jax: 0.10.0
libtpu: 0.0.40
codegen_flags: <defaults>
</compile_context>

<pallas_src>
import jax
import jax.numpy as jnp
from jax.experimental import pallas as pl
from jax.experimental.pallas import tpu as pltpu

NUM_CLASSES = 10
CLS_PAD = 128          # lane-dense padded class dimension
NEG_BIG = -1e30        # baked into padded bias cols; exp() underflows to 0 in f32


def _round_up(n, m):
    return ((n + m - 1) // m) * m


def mlp_kernel(x_ref, w1_ref, b1_ref, w2_ref, b2_ref, w3_ref, b3_ref, o_ref):
    # fc1 + relu : (bm,784)f32 -> bf16 @ (784,512)bf16 -> f32 accumulate
    x = x_ref[...].astype(jnp.bfloat16)
    h1 = jnp.dot(x, w1_ref[...], preferred_element_type=jnp.float32)
    h1 = jnp.maximum(h1 + b1_ref[...], 0.0)
    # fc2 + relu : (bm,512) @ (512,128) -> f32
    h2 = jnp.dot(h1.astype(jnp.bfloat16), w2_ref[...],
                 preferred_element_type=jnp.float32)
    h2 = jnp.maximum(h2 + b2_ref[...], 0.0)
    # fc3 (class dim padded to 128) : (bm,128) @ (128,128) -> f32
    # Padded W3 columns are zero and padded bias columns are -1e30, so the
    # padded logits are exactly -1e30 -> ignored by log-softmax. No mask op.
    logits = jnp.dot(h2.astype(jnp.bfloat16), w3_ref[...],
                     preferred_element_type=jnp.float32) + b3_ref[...]
    # numerically-stable log_softmax over classes (dim=1)
    m = jnp.max(logits, axis=-1, keepdims=True)
    shifted = logits - m
    lse = jnp.log(jnp.sum(jnp.exp(shifted), axis=-1, keepdims=True))
    o_ref[...] = (shifted - lse).astype(o_ref.dtype)


def prepare_params(params):
    """One-time conversion to kernel-ready layout:
    bf16 weights for the MXU, f32 biases, fc3 zero-padded 10 -> 128 class lanes,
    fc3 bias padded with -1e30 (class mask baked in)."""
    w1, b1, w2, b2, w3, b3 = params
    w1b = w1.astype(jnp.bfloat16)
    w2b = w2.astype(jnp.bfloat16)
    w3p = jnp.zeros((w3.shape[0], CLS_PAD), jnp.bfloat16)
    w3p = w3p.at[:, :NUM_CLASSES].set(w3.astype(jnp.bfloat16))
    b3p = jnp.full((1, CLS_PAD), NEG_BIG, jnp.float32)
    b3p = b3p.at[:, :NUM_CLASSES].set(b3)
    return (w1b, b1.astype(jnp.float32), w2b, b2.astype(jnp.float32), w3p, b3p)


def _choose_bm(B, bm_hint):
    """Batch tile selection.
    Tiny batches: a single 8-granular tile (f32 sublane granularity) so an
    8-row input doesn't pay for 128 padded rows. Large batches: 256-granular
    tiles (v6e/v7x 256-wide MXU), default 512, and >=2 grid steps where
    possible so the 'parallel' batch axis shards across v7x's two TensorCores.
    bm=512 stays well under v5e's 16 MiB scoped-VMEM default."""
    Bp8 = _round_up(B, 8)
    if Bp8 <= 256:
        return Bp8
    bm = min(_round_up(bm_hint, 256), _round_up(Bp8, 256))
    if _round_up(Bp8, bm) == bm and bm > 256:   # single grid step -> split in two
        bm = max(256, _round_up((Bp8 + 1) // 2, 256))
    return bm


def mlp_forward(x_nchw, kparams, *, bm=512):
    """Fused MLP forward. kparams must come from prepare_params()."""
    w1b, b1, w2b, b2, w3p, b3p = kparams
    B = x_nchw.shape[0]
    x = x_nchw.reshape(B, 28 * 28).astype(jnp.float32)   # x.view(-1, 784), f32 fed as-is

    bm = _choose_bm(B, bm)
    Bp = _round_up(B, bm)
    if Bp != B:
        x = jnp.pad(x, ((0, Bp - B), (0, 0)))

    grid = (Bp // bm,)
    full = lambda i: (0, 0)  # weights/biases are grid-invariant (stay resident)
    out = pl.pallas_call(
        mlp_kernel,
        out_shape=jax.ShapeDtypeStruct((Bp, CLS_PAD), jnp.float32),
        grid_spec=pltpu.PrefetchScalarGridSpec(
            num_scalar_prefetch=0,
            grid=grid,
            in_specs=[
                pl.BlockSpec((bm, 784), lambda i: (i, 0)),    # x tile (f32)
                pl.BlockSpec((784, 512), full),               # W1^T (bf16)
                pl.BlockSpec((1, 512), full),                 # b1  (f32)
                pl.BlockSpec((512, 128), full),               # W2^T (bf16)
                pl.BlockSpec((1, 128), full),                 # b2  (f32)
                pl.BlockSpec((128, CLS_PAD), full),           # W3^T padded (bf16)
                pl.BlockSpec((1, CLS_PAD), full),             # b3  padded+masked (f32)
            ],
            out_specs=pl.BlockSpec((bm, CLS_PAD), lambda i: (i, 0)),
        ),
        compiler_params=pltpu.CompilerParams(
            # batch tiles shard across the two TensorCores on v7x
            dimension_semantics=("parallel",),
        ),
    )(x, w1b, b1, w2b, b2, w3p, b3p)
    return out[:B, :NUM_CLASSES]


def init_params(key):
    """Deterministic init mirroring nn.Linear default (uniform ±1/sqrt(fan_in)).
    Weights are stored transposed: (in_features, out_features)."""
    dims = [(784, 512), (512, 128), (128, 10)]
    params = []
    for (fan_in, fan_out) in dims:
        key, kw, kb = jax.random.split(key, 3)
        bound = 1.0 / jnp.sqrt(fan_in)
        w = jax.random.uniform(kw, (fan_in, fan_out), jnp.float32, -bound, bound)
        b = jax.random.uniform(kb, (1, fan_out), jnp.float32, -bound, bound)
        params += [w, b]
    return tuple(params)


def mlp_reference(x_nchw, params):
    w1, b1, w2, b2, w3, b3 = params
    x = x_nchw.reshape(x_nchw.shape[0], 28 * 28)
    h1 = jax.nn.relu(x @ w1 + b1)
    h2 = jax.nn.relu(h1 @ w2 + b2)
    logits = h2 @ w3 + b3
    return jax.nn.log_softmax(logits, axis=1)


if __name__ == "__main__":
    key = jax.random.PRNGKey(0)
    kp, kx = jax.random.split(key)
    params = init_params(kp)
    kparams = prepare_params(params)   # one-time kernel-ready layout

    # Small batch of MNIST-shaped inputs, NCHW like PyTorch.
    B = 8
    x = jax.random.normal(kx, (B, 1, 28, 28), jnp.float32)

    fwd = jax.jit(lambda xi: mlp_forward(xi, kparams))
    out = jax.block_until_ready(fwd(x))

    ref = mlp_reference(x, params)
    assert out.shape == (B, 10)
    # bf16 MXU inputs (f32 accumulation) -> compare against the f32 reference
    # with a bf16-appropriate tolerance.
    assert jnp.allclose(out, ref, atol=5e-2, rtol=5e-2), "mismatch vs reference"
    # log-softmax rows must exponentiate to a proper distribution.
    assert jnp.allclose(jnp.sum(jnp.exp(out), axis=1), 1.0, atol=1e-3), "not a log-softmax"

    print("KERNEL_OK")
</pallas_src>

<mosaic_0001>
module attributes {stable_mosaic.version = 11 : i64} {
  func.func @mlp_kernel(%arg0: i32, %arg1: memref<8x784xf32, #tpu.memory_space<vmem>>, %arg2: memref<784x512xbf16, #tpu.memory_space<vmem>>, %arg3: memref<1x512xf32, #tpu.memory_space<vmem>>, %arg4: memref<512x128xbf16, #tpu.memory_space<vmem>>, %arg5: memref<1x128xf32, #tpu.memory_space<vmem>>, %arg6: memref<128x128xbf16, #tpu.memory_space<vmem>>, %arg7: memref<1x128xf32, #tpu.memory_space<vmem>>, %arg8: memref<8x128xf32, #tpu.memory_space<vmem>>) attributes {dimension_semantics = [#tpu.dimension_semantics<parallel>], iteration_bounds = array<i64: 1>, scalar_prefetch = 0 : i64, scratch_operands = 0 : i64, tpu.core_type = #tpu.core_type<tc>, window_params = [{transform_indices = @transform_0, window_bounds = array<i64: 8, 784>}, {pipeline_mode = #tpu.pipeline_mode<synchronous>, transform_indices = @transform_1, window_bounds = array<i64: 784, 512>}, {pipeline_mode = #tpu.pipeline_mode<synchronous>, transform_indices = @transform_2, window_bounds = array<i64: 1, 512>}, {pipeline_mode = #tpu.pipeline_mode<synchronous>, transform_indices = @transform_3, window_bounds = array<i64: 512, 128>}, {pipeline_mode = #tpu.pipeline_mode<synchronous>, transform_indices = @transform_4, window_bounds = array<i64: 1, 128>}, {pipeline_mode = #tpu.pipeline_mode<synchronous>, transform_indices = @transform_5, window_bounds = array<i64: 128, 128>}, {pipeline_mode = #tpu.pipeline_mode<synchronous>, transform_indices = @transform_6, window_bounds = array<i64: 1, 128>}, {transform_indices = @transform_7, window_bounds = array<i64: 8, 128>}]} {
    %c0 = arith.constant 0 : index
    %c0_0 = arith.constant 0 : index
    %0 = vector.load %arg1[%c0, %c0_0] : memref<8x784xf32, #tpu.memory_space<vmem>>, vector<8x784xf32>
    %1 = arith.truncf %0 : vector<8x784xf32> to vector<8x784xbf16>
    %c0_1 = arith.constant 0 : index
    %c0_2 = arith.constant 0 : index
    %2 = vector.load %arg2[%c0_1, %c0_2] : memref<784x512xbf16, #tpu.memory_space<vmem>>, vector<784x512xbf16>
    %cst = arith.constant dense<0.000000e+00> : vector<8x512xf32>
    %3 = tpu.matmul %1, %2, %cst {dimension_numbers = #tpu.dot_dimension_numbers<[1], [0], [0], [1], [0, 0, 1, 1], [], []>} : vector<8x784xbf16>, vector<784x512xbf16>, vector<8x512xf32> -> vector<8x512xf32>
    %c0_3 = arith.constant 0 : index
    %c0_4 = arith.constant 0 : index
    %4 = vector.load %arg3[%c0_3, %c0_4] : memref<1x512xf32, #tpu.memory_space<vmem>>, vector<1x512xf32>
    %5 = vector.broadcast %4 : vector<1x512xf32> to vector<8x512xf32>
    %6 = arith.addf %3, %5 : vector<8x512xf32>
    %cst_5 = arith.constant 0.000000e+00 : f32
    %7 = vector.broadcast %cst_5 : f32 to vector<8x512xf32>
    %8 = arith.maximumf %6, %7 : vector<8x512xf32>
    %9 = arith.truncf %8 : vector<8x512xf32> to vector<8x512xbf16>
    %c0_6 = arith.constant 0 : index
    %c0_7 = arith.constant 0 : index
    %10 = vector.load %arg4[%c0_6, %c0_7] : memref<512x128xbf16, #tpu.memory_space<vmem>>, vector<512x128xbf16>
    %cst_8 = arith.constant dense<0.000000e+00> : vector<8x128xf32>
    %11 = tpu.matmul %9, %10, %cst_8 {dimension_numbers = #tpu.dot_dimension_numbers<[1], [0], [0], [1], [0, 0, 1, 1], [], []>} : vector<8x512xbf16>, vector<512x128xbf16>, vector<8x128xf32> -> vector<8x128xf32>
    %c0_9 = arith.constant 0 : index
    %c0_10 = arith.constant 0 : index
    %12 = vector.load %arg5[%c0_9, %c0_10] : memref<1x128xf32, #tpu.memory_space<vmem>>, vector<1x128xf32>
    %13 = vector.broadcast %12 : vector<1x128xf32> to vector<8x128xf32>
    %14 = arith.addf %11, %13 : vector<8x128xf32>
    %cst_11 = arith.constant 0.000000e+00 : f32
    %15 = vector.broadcast %cst_11 : f32 to vector<8x128xf32>
    %16 = arith.maximumf %14, %15 : vector<8x128xf32>
    %17 = arith.truncf %16 : vector<8x128xf32> to vector<8x128xbf16>
    %c0_12 = arith.constant 0 : index
    %c0_13 = arith.constant 0 : index
    %18 = vector.load %arg6[%c0_12, %c0_13] : memref<128x128xbf16, #tpu.memory_space<vmem>>, vector<128x128xbf16>
    %cst_14 = arith.constant dense<0.000000e+00> : vector<8x128xf32>
    %19 = tpu.matmul %17, %18, %cst_14 {dimension_numbers = #tpu.dot_dimension_numbers<[1], [0], [0], [1], [0, 0, 1, 1], [], []>} : vector<8x128xbf16>, vector<128x128xbf16>, vector<8x128xf32> -> vector<8x128xf32>
    %c0_15 = arith.constant 0 : index
    %c0_16 = arith.constant 0 : index
    %20 = vector.load %arg7[%c0_15, %c0_16] : memref<1x128xf32, #tpu.memory_space<vmem>>, vector<1x128xf32>
    %21 = vector.broadcast %20 : vector<1x128xf32> to vector<8x128xf32>
    %22 = arith.addf %19, %21 : vector<8x128xf32>
    %cst_17 = arith.constant dense<0xFF800000> : vector<8xf32>
    %23 = vector.multi_reduction <maximumf>, %22, %cst_17 [1] : vector<8x128xf32> to vector<8xf32>
    %24 = vector.shape_cast %23 : vector<8xf32> to vector<8x1xf32>
    %25 = vector.broadcast %24 : vector<8x1xf32> to vector<8x128xf32>
    %26 = arith.subf %22, %25 : vector<8x128xf32>
    %27 = math.exp %26 : vector<8x128xf32>
    %cst_18 = arith.constant dense<0.000000e+00> : vector<8xf32>
    %28 = vector.multi_reduction <add>, %27, %cst_18 [1] : vector<8x128xf32> to vector<8xf32>
    %29 = vector.shape_cast %28 : vector<8xf32> to vector<8x1xf32>
    %30 = math.log %29 : vector<8x1xf32>
    %31 = vector.broadcast %30 : vector<8x1xf32> to vector<8x128xf32>
    %32 = arith.subf %26, %31 : vector<8x128xf32>
    %c0_19 = arith.constant 0 : index
    %c0_20 = arith.constant 0 : index
    %33 = vector.load %arg8[%c0_19, %c0_20] : memref<8x128xf32, #tpu.memory_space<vmem>>, vector<8x128xf32>
    tpu.vector_store %arg8[%c0_19, %c0_20], %32 {strides = array<i32>} : memref<8x128xf32, #tpu.memory_space<vmem>>, vector<8x128xf32>,
    return
  }
  func.func @transform_0(%arg0: i32) -> (i32, i32) {
    %c0_i32 = arith.constant 0 : i32
    %c0_i32_0 = arith.constant 0 : i32
    return %arg0, %c0_i32 : i32, i32
  }
  func.func @transform_1(%arg0: i32) -> (i32, i32) {
    %c0_i32 = arith.constant 0 : i32
    %c0_i32_0 = arith.constant 0 : i32
    %c0_i32_1 = arith.constant 0 : i32
    return %c0_i32, %c0_i32_0 : i32, i32
  }
  func.func @transform_2(%arg0: i32) -> (i32, i32) {
    %c0_i32 = arith.constant 0 : i32
    %c0_i32_0 = arith.constant 0 : i32
    %c0_i32_1 = arith.constant 0 : i32
    return %c0_i32, %c0_i32_0 : i32, i32
  }
  func.func @transform_3(%arg0: i32) -> (i32, i32) {
    %c0_i32 = arith.constant 0 : i32
    %c0_i32_0 = arith.constant 0 : i32
    %c0_i32_1 = arith.constant 0 : i32
    return %c0_i32, %c0_i32_0 : i32, i32
  }
  func.func @transform_4(%arg0: i32) -> (i32, i32) {
    %c0_i32 = arith.constant 0 : i32
    %c0_i32_0 = arith.constant 0 : i32
    %c0_i32_1 = arith.constant 0 : i32
    return %c0_i32, %c0_i32_0 : i32, i32
  }
  func.func @transform_5(%arg0: i32) -> (i32, i32) {
    %c0_i32 = arith.constant 0 : i32
    %c0_i32_0 = arith.constant 0 : i32
    %c0_i32_1 = arith.constant 0 : i32
    return %c0_i32, %c0_i32_0 : i32, i32
  }
  func.func @transform_6(%arg0: i32) -> (i32, i32) {
    %c0_i32 = arith.constant 0 : i32
    %c0_i32_0 = arith.constant 0 : i32
    %c0_i32_1 = arith.constant 0 : i32
    return %c0_i32, %c0_i32_0 : i32, i32
  }
  func.func @transform_7(%arg0: i32) -> (i32, i32) {
    %c0_i32 = arith.constant 0 : i32
    %c0_i32_0 = arith.constant 0 : i32
    return %arg0, %c0_i32 : i32, i32
  }
}

</mosaic_0001>

<bundles_post_ra>
// kernel: _lambda_.1
= control target key start
LH: loop header
LB: loop body
LE: loop exit
PB: predicated region body
PF: predicated region fallthrough
CT: control target
= control target key end

     0   :  { %12 = vsyncpa [#allocation3], 0  ;;  %s3013_s0 = inlined_call_operand.vmem [shape: f32[8,784], index: 0, kind: input, shape index: {}]   ;;  %s3014_s1 = inlined_call_operand.hbm [shape: bf16[784,512], index: 1, kind: input, shape index: {}]   ;;  %s3015_s2 = inlined_call_operand.vmem [shape: f32[1,512], index: 2, kind: input, shape index: {}]   ;;  %s3016_s3 = inlined_call_operand.vmem [shape: bf16[512,128], index: 3, kind: input, shape index: {}]   ;;  %s3017_s4 = inlined_call_operand.vmem [shape: f32[1,128], index: 4, kind: input, shape index: {}]   ;;  %s3018_s5 = inlined_call_operand.vmem [shape: bf16[128,128], index: 5, kind: input, shape index: {}]   ;;  %s3019_s6 = inlined_call_operand.vmem [shape: f32[1,128], index: 6, kind: input, shape index: {}]   ;;  %s3020_s7 = inlined_call_operand.hbm [shape: f32[8,128], index: 7, kind: output, shape index: {}]  }
   0x1   :  { %13 = vsyncpa [#allocation4], 0  ;;  %s2778_s24 = smov [#allocation2]  }
   0x2   :  { %s21_s25 = sshll.u32 %s2778_s24, 4  ;;  %s22_s25 = int_to_ptr.vmem [resolvable:$true] %s21_s25 }
   0x3   :  { %s2742_s26 = scalar_lea.vmem %s22_s25, 25088  ;;  %p2747_p1 = scmp.lt.s32.totalorder %s22_s25, %s22_s25 }
   0x4   :  { %p2743_p0 = scmp.ne.s32.totalorder %s22_s25, %s2742_s26  ;;  %p2748_p2 = scmp.lt.s32.totalorder %s2742_s26, %s2742_s26 }
   0x6   :  { %p2749_p3 = por %p2748_p2, %p2747_p1 }
   0x8   :  { %p2750_p4 = pnand %p2749_p3, %p2743_p0 }
   0xa   :  { %2753 = shalt.err (!%p2750_p4)
}
   0xb   :  { %s2779_s27 = smov 256   ;;  %s2780_s28 = smov 16  }
   0xc   :  { %27 = dma.hbm_to_vmem [thread:$0]  %s3014_s1, 25088, %s22_s25, [#allocation3], %s2779_s27, %s2779_s27, %s2780_s28  }
   0xd   :  { %2774 = dma.done.wait [#allocation3], 25088  }
   0xe   :  { %2775 = vsyncadd [#allocation3], 4294942208  ;;  %v2396_v0 = vld [vmem:[#allocation2 + $0xe4] ss:$16 sps:$4 sm:$0xff]   ;;  %v2400_v2 = vld [vmem:[#allocation2 + $0xe0] ss:$16 sps:$4 sm:$0xff]  }
   0xf   :  { %v2398_v1 = vld [vmem:[#allocation2 + $0x2e4] ss:$16 sps:$4 sm:$0xff]   ;;  %1258 = vmatprep.subr.bf16.mxu0 %v2396_v0  ;;  %v2401_v3 = vld [vmem:[#allocation2 + $0x2e0] ss:$16 sps:$4 sm:$0xff]   ;;  %v43_v46 = vld [vmem:[%s3013_s0 + $0x8] sm:$0xff]  ;;  %vm1254_vm0 = vcmask 130048  }
  0x10   :  { %1299 = vmatprep.subr.bf16.mxu1 %v2398_v1  ;;  %v2402_v4 = vld [vmem:[#allocation2 + $0xc4] ss:$16 sps:$4 sm:$0xff]   ;;  %1259 = vmatpush1.bf16.msra.mxu0 %v2400_v2  ;;  %v2406_v6 = vld [vmem:[#allocation2 + $0xc0] ss:$16 sps:$4 sm:$0xff]   ;;  %v2831_v49 = vpack.c.bf16 %v43_v46, %v43_v46  ;;  %v45_v50 = vld [vmem:[%s3013_s0 + $0x18] sm:$0xff]  ;;  %vm2783_vm1 = vmmov 0  }
  0x11   :  { %1300 = vmatpush1.bf16.msra.mxu1 %v2401_v3  ;;  %v2404_v5 = vld [vmem:[#allocation2 + $0x2c4] ss:$16 sps:$4 sm:$0xff]   ;;  %1260 = vmatprep.subr.bf16.mxu0 %v2402_v4  ;;  %v2407_v7 = vld [vmem:[#allocation2 + $0x2c0] ss:$16 sps:$4 sm:$0xff]   ;;  %v2836_v52 = vpack.c.bf16 %v45_v50, %v45_v50 }
  0x12   :  { %1301 = vmatprep.subr.bf16.mxu1 %v2404_v5  ;;  %v2408_v8 = vld [vmem:[#allocation2 + $0xa4] ss:$16 sps:$4 sm:$0xff]   ;;  %v2412_v10 = vld [vmem:[#allocation2 + $0xa0] ss:$16 sps:$4 sm:$0xff]   ;;  %1290 = vmatprep.mubr.bf16.mxu0 %v2831_v49 }
  0x13   :  { %v2410_v9 = vld [vmem:[#allocation2 + $0x2a4] ss:$16 sps:$4 sm:$0xff]   ;;  %v2413_v11 = vld [vmem:[#allocation2 + $0x2a0] ss:$16 sps:$4 sm:$0xff]   ;;  %1331 = vmatprep.mubr.bf16.mxu1 %v2836_v52 }
  0x14   :  { %1261 = vmatpush1.bf16.msra.mxu0 %v2406_v6  ;;  %v2414_v12 = vld [vmem:[#allocation2 + $0x84] ss:$16 sps:$4 sm:$0xff]   ;;  %v2418_v14 = vld [vmem:[#allocation2 + $0x80] ss:$16 sps:$4 sm:$0xff]  }
  0x15   :  { %1302 = vmatpush1.bf16.msra.mxu1 %v2407_v7  ;;  %1262 = vmatprep.subr.bf16.mxu0 %v2408_v8  ;;  %v2416_v13 = vld [vmem:[#allocation2 + $0x284] ss:$16 sps:$4 sm:$0xff]   ;;  %v2419_v15 = vld [vmem:[#allocation2 + $0x280] ss:$16 sps:$4 sm:$0xff]  }
  0x16   :  { %1303 = vmatprep.subr.bf16.mxu1 %v2410_v9  ;;  %v2420_v16 = vld [vmem:[#allocation2 + $0x64] ss:$16 sps:$4 sm:$0xff]   ;;  %v2424_v18 = vld [vmem:[#allocation2 + $0x60] ss:$16 sps:$4 sm:$0xff]  }
  0x17   :  { %v2422_v17 = vld [vmem:[#allocation2 + $0x264] ss:$16 sps:$4 sm:$0xff]   ;;  %v2425_v19 = vld [vmem:[#allocation2 + $0x260] ss:$16 sps:$4 sm:$0xff]  }
  0x18   :  { %1263 = vmatpush1.bf16.msra.mxu0 %v2412_v10  ;;  %v2426_v20 = vld [vmem:[#allocation2 + $0x44] ss:$16 sps:$4 sm:$0xff]   ;;  %v2430_v22 = vld [vmem:[#allocation2 + $0x40] ss:$16 sps:$4 sm:$0xff]  }
  0x19   :  { %1304 = vmatpush1.bf16.msra.mxu1 %v2413_v11  ;;  %1264 = vmatprep.subr.bf16.mxu0 %v2414_v12  ;;  %v2428_v21 = vld [vmem:[#allocation2 + $0x244] ss:$16 sps:$4 sm:$0xff]   ;;  %v2431_v23 = vld [vmem:[#allocation2 + $0x240] ss:$16 sps:$4 sm:$0xff]  }
  0x1a   :  { %1305 = vmatprep.subr.bf16.mxu1 %v2416_v13  ;;  %v2432_v24 = vld [vmem:[#allocation2 + $0x24] ss:$16 sps:$4 sm:$0xff]   ;;  %v2436_v26 = vld [vmem:[#allocation2 + $0x20] ss:$16 sps:$4 sm:$0xff]   ;;  %v2503_v13 = vld [vmem:[#allocation2 + $0xec] ss:$16 sps:$4 sm:$0xff]  }
  0x1b   :  { %v2434_v25 = vld [vmem:[#allocation2 + $0x224] ss:$16 sps:$4 sm:$0xff]   ;;  %v2437_v27 = vld [vmem:[#allocation2 + $0x220] ss:$16 sps:$4 sm:$0xff]  }
  0x1c   :  { %1265 = vmatpush1.bf16.msra.mxu0 %v2418_v14  ;;  %v2438_v28 = vld [vmem:[#allocation2 + $0x4] ss:$16 sps:$4 sm:$0xff]   ;;  %v2442_v30 = vld [vmem:[#allocation2] ss:$16 sps:$4 sm:$0xff]  }
  0x1d   :  { %1306 = vmatpush1.bf16.msra.mxu1 %v2419_v15  ;;  %1266 = vmatprep.subr.bf16.mxu0 %v2420_v16  ;;  %v2440_v29 = vld [vmem:[#allocation2 + $0x204] ss:$16 sps:$4 sm:$0xff]   ;;  %v2443_v31 = vld [vmem:[#allocation2 + $0x200] ss:$16 sps:$4 sm:$0xff]   ;;  %v2781_v16 = vmov 0  }
  0x1e   :  { %1307 = vmatprep.subr.bf16.mxu1 %v2422_v17  ;;  %v2444_v32 = vld [vmem:[#allocation2 + $0x1e4] ss:$16 sps:$4 sm:$0xff]   ;;  %v2448_v34 = vld [vmem:[#allocation2 + $0x1e0] ss:$16 sps:$4 sm:$0xff]  }
  0x1f   :  { %v2446_v33 = vld [vmem:[#allocation2 + $0x3e4] ss:$16 sps:$4 sm:$0xff]   ;;  %v2449_v35 = vld [vmem:[#allocation2 + $0x3e0] ss:$16 sps:$4 sm:$0xff]  }
  0x20   :  { %1267 = vmatpush1.bf16.msra.mxu0 %v2424_v18  ;;  %v2450_v36 = vld [vmem:[#allocation2 + $0x1c4] ss:$16 sps:$4 sm:$0xff]   ;;  %v2454_v38 = vld [vmem:[#allocation2 + $0x1c0] ss:$16 sps:$4 sm:$0xff]   ;;  %v2501_v18 = vld [vmem:[#allocation2 + $0xe8] ss:$16 sps:$4 sm:$0xff]  }
  0x21   :  { %1308 = vmatpush1.bf16.msra.mxu1 %v2425_v19  ;;  %1268 = vmatprep.subr.bf16.mxu0 %v2426_v20  ;;  %v2452_v37 = vld [vmem:[#allocation2 + $0x3c4] ss:$16 sps:$4 sm:$0xff]   ;;  %v2455_v39 = vld [vmem:[#allocation2 + $0x3c0] ss:$16 sps:$4 sm:$0xff]  }
  0x22   :  { %1309 = vmatprep.subr.bf16.mxu1 %v2428_v21  ;;  %v2456_v40 = vld [vmem:[#allocation2 + $0x1a4] ss:$16 sps:$4 sm:$0xff]   ;;  %v2460_v42 = vld [vmem:[#allocation2 + $0x1a0] ss:$16 sps:$4 sm:$0xff]   ;;  %v2509_v21 = vld [vmem:[#allocation2 + $0xcc] ss:$16 sps:$4 sm:$0xff]  }
  0x23   :  { %v2458_v41 = vld [vmem:[#allocation2 + $0x3a4] ss:$16 sps:$4 sm:$0xff]   ;;  %v2461_v43 = vld [vmem:[#allocation2 + $0x3a0] ss:$16 sps:$4 sm:$0xff]  }
  0x24   :  { %1269 = vmatpush1.bf16.msra.mxu0 %v2430_v22  ;;  %v2462_v44 = vld [vmem:[#allocation2 + $0x184] ss:$16 sps:$4 sm:$0xff]   ;;  %v2466_v47 = vld [vmem:[#allocation2 + $0x180] ss:$16 sps:$4 sm:$0xff]  }
  0x25   :  { %1310 = vmatpush1.bf16.msra.mxu1 %v2431_v23  ;;  %1270 = vmatprep.subr.bf16.mxu0 %v2432_v24  ;;  %v2464_v45 = vld [vmem:[#allocation2 + $0x384] ss:$16 sps:$4 sm:$0xff]   ;;  %v2467_v48 = vld [vmem:[#allocation2 + $0x380] ss:$16 sps:$4 sm:$0xff]   ;;  %v2507_v23 = vld [vmem:[#allocation2 + $0xc8] ss:$16 sps:$4 sm:$0xff]  }
  0x26   :  { %1311 = vmatprep.subr.bf16.mxu1 %v2434_v25  ;;  %v2468_v51 = vld [vmem:[#allocation2 + $0x164] ss:$16 sps:$4 sm:$0xff]   ;;  %v2472_v54 = vld [vmem:[#allocation2 + $0x160] ss:$16 sps:$4 sm:$0xff]   ;;  %v2515_v25 = vld [vmem:[#allocation2 + $0xac] ss:$16 sps:$4 sm:$0xff]  }
  0x27   :  { %v2470_v53 = vld [vmem:[#allocation2 + $0x364] ss:$16 sps:$4 sm:$0xff]   ;;  %v2473_v55 = vld [vmem:[#allocation2 + $0x360] ss:$16 sps:$4 sm:$0xff]  }
  0x28   :  { %1271 = vmatpush1.bf16.msra.mxu0 %v2436_v26  ;;  %v2474_v56 = vld [vmem:[#allocation2 + $0x144] ss:$16 sps:$4 sm:$0xff]   ;;  %v2478_v58 = vld [vmem:[#allocation2 + $0x140] ss:$16 sps:$4 sm:$0xff]  }
  0x29   :  { %1312 = vmatpush1.bf16.msra.mxu1 %v2437_v27  ;;  %1272 = vmatprep.subr.bf16.mxu0 %v2438_v28  ;;  %v2476_v57 = vld [vmem:[#allocation2 + $0x344] ss:$16 sps:$4 sm:$0xff]   ;;  %v2479_v59 = vld [vmem:[#allocation2 + $0x340] ss:$16 sps:$4 sm:$0xff]   ;;  %v2513_v27 = vld [vmem:[#allocation2 + $0xa8] ss:$16 sps:$4 sm:$0xff]  }
  0x2a   :  { %1313 = vmatprep.subr.bf16.mxu1 %v2440_v29  ;;  %v2480_v60 = vld [vmem:[#allocation2 + $0x124] ss:$16 sps:$4 sm:$0xff]   ;;  %v2484_v62 = vld [vmem:[#allocation2 + $0x120] ss:$16 sps:$4 sm:$0xff]   ;;  %v2521_v29 = vld [vmem:[#allocation2 + $0x8c] ss:$16 sps:$4 sm:$0xff]  }
  0x2b   :  { %v2482_v61 = vld [vmem:[#allocation2 + $0x324] ss:$16 sps:$4 sm:$0xff]   ;;  %v2485_v63 = vld [vmem:[#allocation2 + $0x320] ss:$16 sps:$4 sm:$0xff]  }
  0x2c   :  { %1273 = vmatpush1.bf16.msra.mxu0 %v2442_v30  ;;  %v2486_v0 = vld [vmem:[#allocation2 + $0x104] ss:$16 sps:$4 sm:$0xff]   ;;  %v2490_v2 = vld [vmem:[#allocation2 + $0x100] ss:$16 sps:$4 sm:$0xff]  }
  0x2d   :  { %1314 = vmatpush1.bf16.msra.mxu1 %v2443_v31  ;;  %1274 = vmatprep.subr.bf16.mxu0 %v2444_v32  ;;  %v2488_v1 = vld [vmem:[#allocation2 + $0x304] ss:$16 sps:$4 sm:$0xff]   ;;  %v2491_v3 = vld [vmem:[#allocation2 + $0x300] ss:$16 sps:$4 sm:$0xff]   ;;  %v2519_v31 = vld [vmem:[#allocation2 + $0x88] ss:$16 sps:$4 sm:$0xff]  }
  0x2e   :  { %1315 = vmatprep.subr.bf16.mxu1 %v2446_v33  ;;  %v42_v4 = vld [vmem:[%s3013_s0] sm:$0xff]  ;;  %v44_v5 = vld [vmem:[%s3013_s0 + $0x10] sm:$0xff]  ;;  %v2527_v33 = vld [vmem:[#allocation2 + $0x6c] ss:$16 sps:$4 sm:$0xff]  }
  0x2f   :  { %v2494_v6 = vld [vmem:[#allocation2 + $0x4e4] ss:$16 sps:$4 sm:$0xff]   ;;  %v2846_v8 = vpack.c.bf16 %v42_v4, %v42_v4  ;;  %v2848_v9 = vpack.c.bf16 %v44_v5, %v44_v5  ;;  %v2492_v10 = vld [vmem:[#allocation2 + $0x4e0] ss:$16 sps:$4 sm:$0xff]   ;;  %v2575_v4 = vld [vmem:[#allocation2 + $0x16c] ss:$16 sps:$4 sm:$0xff]  }
  0x30   :  { %1275 = vmatpush2.bf16.msra.mxu0 %v2448_v34  ;;  %v2497_v7 = vld [vmem:[#allocation2 + $0x604] ss:$16 sps:$4 sm:$0xff]   ;;  %v2495_v11 = vld [vmem:[#allocation2 + $0x600] ss:$16 sps:$4 sm:$0xff]  }
  0x31   :  { %1316 = vmatpush2.bf16.msra.mxu1 %v2449_v35  ;;  %1276 = vmatprep.subr.bf16.mxu0 %v2450_v36  ;;  %v2500_v12 = vld [vmem:[#allocation2 + $0x4c4] ss:$16 sps:$4 sm:$0xff]   ;;  %v2498_v14 = vld [vmem:[#allocation2 + $0x4c0] ss:$16 sps:$4 sm:$0xff]   ;;  %v47_v35 = vld [vmem:[%s3013_s0 + $0x28] sm:$0xff] }
  0x32   :  { %1317 = vmatprep.subr.bf16.mxu1 %v2452_v37  ;;  %v48_v15 = vld [vmem:[%s3013_s0 + $0x30] sm:$0xff]  ;;  %v2864_v36 = vpack.c.bf16 %v47_v35, %v47_v35  ;;  %v2525_v37 = vld [vmem:[#allocation2 + $0x68] ss:$16 sps:$4 sm:$0xff]   ;;  %v2614_v35 = vld [vmem:[#allocation2 + $0x26c] ss:$16 sps:$4 sm:$0xff]  }
  0x33   :  { %v2506_v17 = vld [vmem:[#allocation2 + $0x4a4] ss:$16 sps:$4 sm:$0xff]   ;;  %v2856_v19 = vpack.c.bf16 %v48_v15, %v48_v15  ;;  %v2504_v20 = vld [vmem:[#allocation2 + $0x4a0] ss:$16 sps:$4 sm:$0xff]  }
  0x34   :  { %1277 = vmatpush2.bf16.msra.mxu0 %v2454_v38  ;;  %v2512_v22 = vld [vmem:[#allocation2 + $0x484] ss:$16 sps:$4 sm:$0xff]   ;;  %v2510_v24 = vld [vmem:[#allocation2 + $0x480] ss:$16 sps:$4 sm:$0xff]  }
  0x35   :  { %1318 = vmatpush2.bf16.msra.mxu1 %v2455_v39  ;;  %1278 = vmatprep.subr.bf16.mxu0 %v2456_v40  ;;  %v2518_v26 = vld [vmem:[#allocation2 + $0x464] ss:$16 sps:$4 sm:$0xff]   ;;  %v2516_v28 = vld [vmem:[#allocation2 + $0x460] ss:$16 sps:$4 sm:$0xff]   ;;  %v2533_v39 = vld [vmem:[#allocation2 + $0x4c] ss:$16 sps:$4 sm:$0xff]  }
  0x36   :  { %1319 = vmatprep.subr.bf16.mxu1 %v2458_v41  ;;  %v2524_v30 = vld [vmem:[#allocation2 + $0x444] ss:$16 sps:$4 sm:$0xff]   ;;  %v2522_v32 = vld [vmem:[#allocation2 + $0x440] ss:$16 sps:$4 sm:$0xff]   ;;  %v2531_v41 = vld [vmem:[#allocation2 + $0x48] ss:$16 sps:$4 sm:$0xff]  }
  0x37   :  { %v2530_v34 = vld [vmem:[#allocation2 + $0x424] ss:$16 sps:$4 sm:$0xff]   ;;  %v2528_v38 = vld [vmem:[#allocation2 + $0x420] ss:$16 sps:$4 sm:$0xff]  }
  0x38   :  { %1279 = vmatpush2.bf16.msra.mxu0 %v2460_v42  ;;  %v2536_v40 = vld [vmem:[#allocation2 + $0x404] ss:$16 sps:$4 sm:$0xff]   ;;  %v2534_v42 = vld [vmem:[#allocation2 + $0x400] ss:$16 sps:$4 sm:$0xff]  }
  0x39   :  { %1320 = vmatpush2.bf16.msra.mxu1 %v2461_v43  ;;  %1280 = vmatprep.subr.bf16.mxu0 %v2462_v44  ;;  %v2539_v43 = vld [vmem:[#allocation2 + $0x2c] ss:$16 sps:$4 sm:$0xff]   ;;  %v2542_v44 = vld [vmem:[#allocation2 + $0x5e4] ss:$16 sps:$4 sm:$0xff]   ;;  %v2540_v46 = vld [vmem:[#allocation2 + $0x5e0] ss:$16 sps:$4 sm:$0xff]  }
  0x3a   :  { %1321 = vmatprep.subr.bf16.mxu1 %v2464_v45  ;;  %v2537_v45 = vld [vmem:[#allocation2 + $0x28] ss:$16 sps:$4 sm:$0xff]   ;;  %v2546_v50 = vld [vmem:[#allocation2 + $0x5c0] ss:$16 sps:$4 sm:$0xff]   ;;  %v2578_v5 = vld [vmem:[#allocation2 + $0x524] ss:$16 sps:$4 sm:$0xff]  }
  0x3b   :  { %v46_v15 = vld [vmem:[%s3013_s0 + $0x20] sm:$0xff] }
  0x3c   :  { %1281 = vmatpush2.bf16.msra.mxu0 %v2466_v47  ;;  %v2545_v47 = vld [vmem:[#allocation2 + $0xc] ss:$16 sps:$4 sm:$0xff]  }
  0x3d   :  { %1322 = vmatpush2.bf16.msra.mxu1 %v2467_v48  ;;  %1282 = vmatprep.subr.bf16.mxu0 %v2468_v51  ;;  %v2548_v48 = vld [vmem:[#allocation2 + $0x5c4] ss:$16 sps:$4 sm:$0xff]   ;;  %v2551_v51 = vld [vmem:[#allocation2 + $0x1ec] ss:$16 sps:$4 sm:$0xff]  }
  0x3e   :  { %1323 = vmatprep.subr.bf16.mxu1 %v2470_v53  ;;  %v2554_v53 = vld [vmem:[#allocation2 + $0x5a4] ss:$16 sps:$4 sm:$0xff]  }
  0x40   :  { %1283 = vmatpush2.bf16.msra.mxu0 %v2472_v54  ;;  %v2549_v54 = vld [vmem:[#allocation2 + $0x1e8] ss:$16 sps:$4 sm:$0xff]  }
  0x41   :  { %1324 = vmatpush2.bf16.msra.mxu1 %v2473_v55  ;;  %1284 = vmatprep.subr.bf16.mxu0 %v2474_v56  ;;  %v2552_v55 = vld [vmem:[#allocation2 + $0x5a0] ss:$16 sps:$4 sm:$0xff]   ;;  %v2557_v56 = vld [vmem:[#allocation2 + $0x1cc] ss:$16 sps:$4 sm:$0xff]  }
  0x42   :  { %1325 = vmatprep.subr.bf16.mxu1 %v2476_v57  ;;  %v2560_v57 = vld [vmem:[#allocation2 + $0x584] ss:$16 sps:$4 sm:$0xff]  }
  0x44   :  { %1285 = vmatpush2.bf16.msra.mxu0 %v2478_v58  ;;  %v2555_v58 = vld [vmem:[#allocation2 + $0x1c8] ss:$16 sps:$4 sm:$0xff]  }
  0x45   :  { %1326 = vmatpush2.bf16.msra.mxu1 %v2479_v59  ;;  %1286 = vmatprep.subr.bf16.mxu0 %v2480_v60  ;;  %v2558_v59 = vld [vmem:[#allocation2 + $0x580] ss:$16 sps:$4 sm:$0xff]   ;;  %v2563_v60 = vld [vmem:[#allocation2 + $0x1ac] ss:$16 sps:$4 sm:$0xff]  }
  0x46   :  { %1327 = vmatprep.subr.bf16.mxu1 %v2482_v61  ;;  %v2566_v61 = vld [vmem:[#allocation2 + $0x564] ss:$16 sps:$4 sm:$0xff]  }
  0x48   :  { %1287 = vmatpush2.bf16.msra.mxu0 %v2484_v62  ;;  %v2561_v62 = vld [vmem:[#allocation2 + $0x1a8] ss:$16 sps:$4 sm:$0xff]  }
  0x49   :  { %1328 = vmatpush2.bf16.msra.mxu1 %v2485_v63  ;;  %1288 = vmatprep.subr.bf16.mxu0 %v2486_v0  ;;  %v2564_v63 = vld [vmem:[#allocation2 + $0x560] ss:$16 sps:$4 sm:$0xff]   ;;  %v2569_v0 = vld [vmem:[#allocation2 + $0x18c] ss:$16 sps:$4 sm:$0xff]  }
  0x4a   :  { %1329 = vmatprep.subr.bf16.mxu1 %v2488_v1  ;;  %v2572_v1 = vld [vmem:[#allocation2 + $0x544] ss:$16 sps:$4 sm:$0xff]  }
  0x4c   :  { %1289 = vmatpush2.bf16.msra.mxu0 %v2490_v2  ;;  %v2567_v2 = vld [vmem:[#allocation2 + $0x188] ss:$16 sps:$4 sm:$0xff]  }
  0x4d   :  { %1330 = vmatpush2.bf16.msra.mxu1 %v2491_v3  ;;  %1340 = vmatprep.subr.bf16.mxu0 %v2494_v6  ;;  %v2570_v3 = vld [vmem:[#allocation2 + $0x540] ss:$16 sps:$4 sm:$0xff]   ;;  %v2573_v6 = vld [vmem:[#allocation2 + $0x168] ss:$16 sps:$4 sm:$0xff]  }
  0x4e   :  { %1395 = vmatprep.subr.bf16.mxu1 %v2497_v7  ;;  %v2576_v7 = vld [vmem:[#allocation2 + $0x520] ss:$16 sps:$4 sm:$0xff]  }
  0x4f   :  { %1291 = vmatmul.mubr.bf16.vlgmr.msra.gmra.mxu0 %v2846_v8 }
  0x50   :  { %1332 = vmatmul.mubr.bf16.vlgmr.msra.gmra.mxu1 %v2848_v9  ;;  %1341 = vmatpush1.bf16.msra.mxu0 %v2492_v10  ;;  %v2581_v10 = vld [vmem:[#allocation2 + $0x14c] ss:$16 sps:$4 sm:$0xff]  }
  0x51   :  { %1396 = vmatpush1.bf16.msra.mxu1 %v2495_v11  ;;  %1342 = vmatprep.subr.bf16.mxu0 %v2500_v12  ;;  %v2584_v11 = vld [vmem:[#allocation2 + $0x504] ss:$16 sps:$4 sm:$0xff]   ;;  %v2579_v12 = vld [vmem:[#allocation2 + $0x148] ss:$16 sps:$4 sm:$0xff]  }
  0x52   :  { %1413 = vmatprep.mubr.bf16.mxu1 %v2781_v16  ;;  %1422 = vmatprep.subr.bf16.mxu1 %v2503_v13  ;;  %v2582_v13 = vld [vmem:[#allocation2 + $0x500] ss:$16 sps:$4 sm:$0xff]  }
  0x53   :  { %1372 = vmatprep.mubr.bf16.mxu0 %v2864_v36 }
  0x54   :  { %1343 = vmatpush1.bf16.msra.mxu0 %v2498_v14  ;;  %v2587_v14 = vld [vmem:[#allocation2 + $0x12c] ss:$16 sps:$4 sm:$0xff]  }
  0x55   :  { %1344 = vmatprep.subr.bf16.mxu0 %v2506_v17  ;;  %v2590_v17 = vld [vmem:[#allocation2 + $0x2ec] ss:$16 sps:$4 sm:$0xff]  }
  0x58   :  { %2272 = vmatmul.mubr.msk.bf16.vlgmr.msra.gmra.mxu1 %vm1254_vm0, %v2856_v19  ;;  %1345 = vmatpush1.bf16.msra.mxu0 %v2504_v20  ;;  %v2870_v20 = vpack.c.bf16 %v46_v15, %v46_v15  ;;  %v2677_v15 = vld [vmem:[#allocation2 + $0x54c] ss:$16 sps:$4 sm:$0xff]  }
  0x59   :  { %1423 = vmatpush1.bf16.msra.mxu1 %v2501_v18  ;;  %1346 = vmatprep.subr.bf16.mxu0 %v2512_v22  ;;  %v2585_v18 = vld [vmem:[#allocation2 + $0x128] ss:$16 sps:$4 sm:$0xff]   ;;  %v2593_v22 = vld [vmem:[#allocation2 + $0x10c] ss:$16 sps:$4 sm:$0xff]  }
  0x5a   :  { %1424 = vmatprep.subr.bf16.mxu1 %v2509_v21  ;;  %1454 = vmatprep.mubr.bf16.mxu1 %v2831_v49  ;;  %v2543_v49 = vld [vmem:[#allocation2 + $0x8] ss:$16 sps:$4 sm:$0xff]  }
  0x5b   :  { %v2588_v21 = vld [vmem:[#allocation2 + $0x2e8] ss:$16 sps:$4 sm:$0xff]  }
  0x5c   :  { %1347 = vmatpush1.bf16.msra.mxu0 %v2510_v24  ;;  %v2591_v24 = vld [vmem:[#allocation2 + $0x108] ss:$16 sps:$4 sm:$0xff]  }
  0x5d   :  { %1425 = vmatpush1.bf16.msra.mxu1 %v2507_v23  ;;  %1348 = vmatprep.subr.bf16.mxu0 %v2518_v26  ;;  %v2596_v23 = vld [vmem:[#allocation2 + $0x2cc] ss:$16 sps:$4 sm:$0xff]  }
  0x5e   :  { %1426 = vmatprep.subr.bf16.mxu1 %v2515_v25  ;;  %v2594_v25 = vld [vmem:[#allocation2 + $0x2c8] ss:$16 sps:$4 sm:$0xff]   ;;  %v2599_v26 = vld [vmem:[#allocation2 + $0x4ec] ss:$16 sps:$4 sm:$0xff]  }
  0x60   :  { %1349 = vmatpush1.bf16.msra.mxu0 %v2516_v28  ;;  %v2597_v28 = vld [vmem:[#allocation2 + $0x4e8] ss:$16 sps:$4 sm:$0xff]  }
  0x61   :  { %1427 = vmatpush1.bf16.msra.mxu1 %v2513_v27  ;;  %1350 = vmatprep.subr.bf16.mxu0 %v2524_v30  ;;  %v2602_v27 = vld [vmem:[#allocation2 + $0x2ac] ss:$16 sps:$4 sm:$0xff]  }
  0x62   :  { %1428 = vmatprep.subr.bf16.mxu1 %v2521_v29  ;;  %v2600_v29 = vld [vmem:[#allocation2 + $0x2a8] ss:$16 sps:$4 sm:$0xff]   ;;  %v2605_v30 = vld [vmem:[#allocation2 + $0x4cc] ss:$16 sps:$4 sm:$0xff]  }
  0x64   :  { %1351 = vmatpush1.bf16.msra.mxu0 %v2522_v32  ;;  %v2603_v32 = vld [vmem:[#allocation2 + $0x4c8] ss:$16 sps:$4 sm:$0xff]  }
  0x65   :  { %1429 = vmatpush1.bf16.msra.mxu1 %v2519_v31  ;;  %1352 = vmatprep.subr.bf16.mxu0 %v2530_v34  ;;  %v2608_v31 = vld [vmem:[#allocation2 + $0x28c] ss:$16 sps:$4 sm:$0xff]  }
  0x66   :  { %1430 = vmatprep.subr.bf16.mxu1 %v2527_v33  ;;  %v2606_v33 = vld [vmem:[#allocation2 + $0x288] ss:$16 sps:$4 sm:$0xff]   ;;  %v2611_v34 = vld [vmem:[#allocation2 + $0x4ac] ss:$16 sps:$4 sm:$0xff]  }
  0x68   :  { %1353 = vmatpush1.bf16.msra.mxu0 %v2528_v38  ;;  %v2612_v38 = vld [vmem:[#allocation2 + $0x268] ss:$16 sps:$4 sm:$0xff]  }
  0x69   :  { %1431 = vmatpush1.bf16.msra.mxu1 %v2525_v37  ;;  %1354 = vmatprep.subr.bf16.mxu0 %v2536_v40  ;;  %v2609_v37 = vld [vmem:[#allocation2 + $0x4a8] ss:$16 sps:$4 sm:$0xff]  }
  0x6a   :  { %1432 = vmatprep.subr.bf16.mxu1 %v2533_v39  ;;  %v2620_v39 = vld [vmem:[#allocation2 + $0x24c] ss:$16 sps:$4 sm:$0xff]   ;;  %v2615_v40 = vld [vmem:[#allocation2 + $0x488] ss:$16 sps:$4 sm:$0xff]  }
  0x6c   :  { %1355 = vmatpush1.bf16.msra.mxu0 %v2534_v42  ;;  %v2623_v42 = vld [vmem:[#allocation2 + $0x46c] ss:$16 sps:$4 sm:$0xff]  }
  0x6d   :  { %1433 = vmatpush1.bf16.msra.mxu1 %v2531_v41  ;;  %1356 = vmatprep.subr.bf16.mxu0 %v2542_v44  ;;  %v2618_v41 = vld [vmem:[#allocation2 + $0x248] ss:$16 sps:$4 sm:$0xff]  }
  0x6e   :  { %1434 = vmatprep.subr.bf16.mxu1 %v2539_v43  ;;  %v2621_v43 = vld [vmem:[#allocation2 + $0x468] ss:$16 sps:$4 sm:$0xff]  }
  0x6f   :  { %v2624_v44 = vld [vmem:[#allocation2 + $0x228] ss:$16 sps:$4 sm:$0xff]  }
  0x70   :  { %1357 = vmatpush2.bf16.msra.mxu0 %v2540_v46  ;;  %v2632_v46 = vld [vmem:[#allocation2 + $0x20c] ss:$16 sps:$4 sm:$0xff]  }
  0x71   :  { %1435 = vmatpush1.bf16.msra.mxu1 %v2537_v45  ;;  %1358 = vmatprep.subr.bf16.mxu0 %v2548_v48  ;;  %v2629_v45 = vld [vmem:[#allocation2 + $0x44c] ss:$16 sps:$4 sm:$0xff]  }
  0x72   :  { %1436 = vmatprep.subr.bf16.mxu1 %v2545_v47  ;;  %v2630_v47 = vld [vmem:[#allocation2 + $0x208] ss:$16 sps:$4 sm:$0xff]   ;;  %v2635_v48 = vld [vmem:[#allocation2 + $0x42c] ss:$16 sps:$4 sm:$0xff]  }
  0x74   :  { %1359 = vmatpush2.bf16.msra.mxu0 %v2546_v50  ;;  %v2633_v50 = vld [vmem:[#allocation2 + $0x428] ss:$16 sps:$4 sm:$0xff]  }
  0x75   :  { %1437 = vmatpush1.bf16.msra.mxu1 %v2543_v49  ;;  %1360 = vmatprep.subr.bf16.mxu0 %v2554_v53  ;;  %v2638_v49 = vld [vmem:[#allocation2 + $0x3ec] ss:$16 sps:$4 sm:$0xff]  }
  0x76   :  { %1438 = vmatprep.subr.bf16.mxu1 %v2551_v51  ;;  %v2636_v51 = vld [vmem:[#allocation2 + $0x3e8] ss:$16 sps:$4 sm:$0xff]   ;;  %v2641_v53 = vld [vmem:[#allocation2 + $0x40c] ss:$16 sps:$4 sm:$0xff]  }
  0x78   :  { %1361 = vmatpush2.bf16.msra.mxu0 %v2552_v55  ;;  %v2639_v55 = vld [vmem:[#allocation2 + $0x408] ss:$16 sps:$4 sm:$0xff]  }
  0x79   :  { %1439 = vmatpush2.bf16.msra.mxu1 %v2549_v54  ;;  %1362 = vmatprep.subr.bf16.mxu0 %v2560_v57  ;;  %v2644_v54 = vld [vmem:[#allocation2 + $0x3cc] ss:$16 sps:$4 sm:$0xff]  }
  0x7a   :  { %1440 = vmatprep.subr.bf16.mxu1 %v2557_v56  ;;  %v2642_v56 = vld [vmem:[#allocation2 + $0x3c8] ss:$16 sps:$4 sm:$0xff]   ;;  %v2647_v57 = vld [vmem:[#allocation2 + $0x5ec] ss:$16 sps:$4 sm:$0xff]  }
  0x7c   :  { %1363 = vmatpush2.bf16.msra.mxu0 %v2558_v59  ;;  %v2645_v59 = vld [vmem:[#allocation2 + $0x5e8] ss:$16 sps:$4 sm:$0xff]  }
  0x7d   :  { %1441 = vmatpush2.bf16.msra.mxu1 %v2555_v58  ;;  %1364 = vmatprep.subr.bf16.mxu0 %v2566_v61  ;;  %v2650_v58 = vld [vmem:[#allocation2 + $0x3ac] ss:$16 sps:$4 sm:$0xff]  }
  0x7e   :  { %1442 = vmatprep.subr.bf16.mxu1 %v2563_v60  ;;  %v2648_v60 = vld [vmem:[#allocation2 + $0x3a8] ss:$16 sps:$4 sm:$0xff]   ;;  %v2653_v61 = vld [vmem:[#allocation2 + $0x5cc] ss:$16 sps:$4 sm:$0xff]  }
  0x80   :  { %1365 = vmatpush2.bf16.msra.mxu0 %v2564_v63  ;;  %v2651_v63 = vld [vmem:[#allocation2 + $0x5c8] ss:$16 sps:$4 sm:$0xff]  }
  0x81   :  { %1443 = vmatpush2.bf16.msra.mxu1 %v2561_v62  ;;  %1366 = vmatprep.subr.bf16.mxu0 %v2572_v1  ;;  %v2656_v62 = vld [vmem:[#allocation2 + $0x38c] ss:$16 sps:$4 sm:$0xff]  }
  0x82   :  { %1444 = vmatprep.subr.bf16.mxu1 %v2569_v0  ;;  %v2654_v0 = vld [vmem:[#allocation2 + $0x388] ss:$16 sps:$4 sm:$0xff]   ;;  %v2659_v1 = vld [vmem:[#allocation2 + $0x5ac] ss:$16 sps:$4 sm:$0xff]  }
  0x84   :  { %1367 = vmatpush2.bf16.msra.mxu0 %v2570_v3  ;;  %v2657_v3 = vld [vmem:[#allocation2 + $0x5a8] ss:$16 sps:$4 sm:$0xff]  }
  0x85   :  { %1445 = vmatpush2.bf16.msra.mxu1 %v2567_v2  ;;  %1368 = vmatprep.subr.bf16.mxu0 %v2578_v5  ;;  %v2662_v2 = vld [vmem:[#allocation2 + $0x36c] ss:$16 sps:$4 sm:$0xff]  }
  0x86   :  { %1446 = vmatprep.subr.bf16.mxu1 %v2575_v4  ;;  %v2660_v4 = vld [vmem:[#allocation2 + $0x368] ss:$16 sps:$4 sm:$0xff]   ;;  %v2665_v5 = vld [vmem:[#allocation2 + $0x58c] ss:$16 sps:$4 sm:$0xff]  }
  0x88   :  { %1369 = vmatpush2.bf16.msra.mxu0 %v2576_v7  ;;  %v2663_v7 = vld [vmem:[#allocation2 + $0x588] ss:$16 sps:$4 sm:$0xff]  }
  0x89   :  { %1447 = vmatpush2.bf16.msra.mxu1 %v2573_v6  ;;  %1370 = vmatprep.subr.bf16.mxu0 %v2584_v11  ;;  %v2668_v6 = vld [vmem:[#allocation2 + $0x34c] ss:$16 sps:$4 sm:$0xff]  }
  0x8a   :  { %1448 = vmatprep.subr.bf16.mxu1 %v2581_v10  ;;  %v2666_v10 = vld [vmem:[#allocation2 + $0x348] ss:$16 sps:$4 sm:$0xff]   ;;  %v2671_v11 = vld [vmem:[#allocation2 + $0x56c] ss:$16 sps:$4 sm:$0xff]  }
  0x8c   :  { %1371 = vmatpush2.bf16.msra.mxu0 %v2582_v13  ;;  %v2669_v13 = vld [vmem:[#allocation2 + $0x568] ss:$16 sps:$4 sm:$0xff]  }
  0x8d   :  { %1449 = vmatpush2.bf16.msra.mxu1 %v2579_v12  ;;  %1463 = vmatprep.subr.bf16.mxu0 %v2590_v17  ;;  %v2674_v12 = vld [vmem:[#allocation2 + $0x32c] ss:$16 sps:$4 sm:$0xff]  }
  0x8e   :  { %1450 = vmatprep.subr.bf16.mxu1 %v2587_v14  ;;  %v2672_v14 = vld [vmem:[#allocation2 + $0x328] ss:$16 sps:$4 sm:$0xff]   ;;  %v2680_v17 = vld [vmem:[#allocation2 + $0x30c] ss:$16 sps:$4 sm:$0xff]  }
  0x8f   :  { %1373 = vmatmul.mubr.bf16.vlgmr.msra.gmra.mxu0 %v2870_v20 }
  0x90   :  { %1464 = vmatpush1.bf16.msra.mxu0 %v2588_v21  ;;  %1495 = vmatprep.mubr.bf16.mxu0 %v2836_v52  ;;  %v2617_v52 = vld [vmem:[#allocation2 + $0x48c] ss:$16 sps:$4 sm:$0xff]   ;;  %v2678_v21 = vld [vmem:[#allocation2 + $0x308] ss:$16 sps:$4 sm:$0xff]  }
  0x91   :  { %1451 = vmatpush2.bf16.msra.mxu1 %v2585_v18  ;;  %1465 = vmatprep.subr.bf16.mxu0 %v2596_v23  ;;  %v2675_v18 = vld [vmem:[#allocation2 + $0x548] ss:$16 sps:$4 sm:$0xff]  }
  0x92   :  { %1452 = vmatprep.subr.bf16.mxu1 %v2593_v22  ;;  %v2683_v22 = vld [vmem:[#allocation2 + $0x52c] ss:$16 sps:$4 sm:$0xff]  }
  0x93   :  { %v2690_v23 = vld [vmem:[%s3016_s3 + $0x78] sm:$0xff]  }
  0x94   :  { %1466 = vmatpush1.bf16.msra.mxu0 %v2594_v25  ;;  %v2691_v25 = vld [vmem:[%s3016_s3 + $0x38] sm:$0xff]  }
  0x95   :  { %1453 = vmatpush2.bf16.msra.mxu1 %v2591_v24  ;;  %1467 = vmatprep.subr.bf16.mxu0 %v2602_v27  ;;  %v2681_v24 = vld [vmem:[#allocation2 + $0x528] ss:$16 sps:$4 sm:$0xff]   ;;  %v2692_v27 = vld [vmem:[%s3016_s3 + $0x70] sm:$0xff]  }
  0x96   :  { %1504 = vmatprep.subr.bf16.mxu1 %v2599_v26  ;;  %v2686_v26 = vld [vmem:[#allocation2 + $0x50c] ss:$16 sps:$4 sm:$0xff]  }
  0x98   :  { %1455 = vmatmul.mubr.bf16.vlgmr.msra.gmra.mxu1 %v2846_v8  ;;  %1468 = vmatpush1.bf16.msra.mxu0 %v2600_v29  ;;  %v2626_v8 = vld [vmem:[#allocation2 + $0x22c] ss:$16 sps:$4 sm:$0xff]   ;;  %v2693_v29 = vld [vmem:[%s3016_s3 + $0x30] sm:$0xff]  }
  0x99   :  { %1505 = vmatpush1.bf16.msra.mxu1 %v2597_v28  ;;  %1469 = vmatprep.subr.bf16.mxu0 %v2608_v31  ;;  %v2684_v28 = vld [vmem:[#allocation2 + $0x508] ss:$16 sps:$4 sm:$0xff]  }
  0x9a   :  { %1506 = vmatprep.subr.bf16.mxu1 %v2605_v30  ;;  %1536 = vmatprep.mubr.bf16.mxu1 %v2864_v36  ;;  %v2627_v36 = vld [vmem:[#allocation2 + $0x448] ss:$16 sps:$4 sm:$0xff]   ;;  %v2689_v30 = vld [vmem:[#allocation2 + $0x60c] ss:$16 sps:$4 sm:$0xff]  }
  0x9b   :  { %v2694_v31 = vld [vmem:[%s3016_s3 + $0x68] sm:$0xff]  }
  0x9c   :  { %1470 = vmatpush1.bf16.msra.mxu0 %v2606_v33  ;;  %v2696_v33 = vld [vmem:[%s3016_s3 + $0x60] sm:$0xff]  }
  0x9d   :  { %1507 = vmatpush1.bf16.msra.mxu1 %v2603_v32  ;;  %1471 = vmatprep.subr.bf16.mxu0 %v2614_v35  ;;  %v2687_v32 = vld [vmem:[#allocation2 + $0x608] ss:$16 sps:$4 sm:$0xff]  }
  0x9e   :  { %1508 = vmatprep.subr.bf16.mxu1 %v2611_v34  ;;  %v2697_v34 = vld [vmem:[%s3016_s3 + $0x20] sm:$0xff]   ;;  %v2698_v35 = vld [vmem:[%s3016_s3 + $0x58] sm:$0xff]  }
  0xa0   :  { %1472 = vmatpush1.bf16.msra.mxu0 %v2612_v38  ;;  %v2708_v38 = vld [vmem:[%s3016_s3 + $0xf0] sm:$0xff]  }
  0xa1   :  { %1509 = vmatpush1.bf16.msra.mxu1 %v2609_v37  ;;  %1473 = vmatprep.subr.bf16.mxu0 %v2620_v39  ;;  %v2699_v37 = vld [vmem:[%s3016_s3 + $0x18] sm:$0xff]   ;;  %v2709_v39 = vld [vmem:[%s3016_s3 + $0xb0] sm:$0xff]  }
  0xa2   :  { %1510 = vmatprep.subr.bf16.mxu1 %v2617_v52  ;;  %v2700_v52 = vld [vmem:[%s3016_s3 + $0x50] sm:$0xff]  }
  0xa4   :  { %1474 = vmatpush1.bf16.msra.mxu0 %v2618_v41  ;;  %v2702_v41 = vld [vmem:[%s3016_s3 + $0x48] sm:$0xff]  }
  0xa5   :  { %1511 = vmatpush1.bf16.msra.mxu1 %v2615_v40  ;;  %1475 = vmatprep.subr.bf16.mxu0 %v2626_v8  ;;  %v2701_v40 = vld [vmem:[%s3016_s3 + $0x10] sm:$0xff]   ;;  %v2705_v8 = vld [vmem:[%s3016_s3] sm:$0xff]  }
  0xa6   :  { %1512 = vmatprep.subr.bf16.mxu1 %v2623_v42  ;;  %v2704_v42 = vld [vmem:[%s3016_s3 + $0x40] sm:$0xff]  }
  0xa8   :  { %1476 = vmatpush1.bf16.msra.mxu0 %v2624_v44 }
  0xa9   :  { %1513 = vmatpush1.bf16.msra.mxu1 %v2621_v43  ;;  %1477 = vmatprep.subr.bf16.mxu0 %v2632_v46  ;;  %v2711_v46 = vld [vmem:[%s3016_s3 + $0xa8] sm:$0xff]  }
  0xaa   :  { %1514 = vmatprep.subr.bf16.mxu1 %v2629_v45  ;;  %v2710_v45 = vld [vmem:[%s3016_s3 + $0xe8] sm:$0xff]  }
  0xac   :  { %1478 = vmatpush1.bf16.msra.mxu0 %v2630_v47 }
  0xad   :  { %1515 = vmatpush1.bf16.msra.mxu1 %v2627_v36  ;;  %1479 = vmatprep.subr.bf16.mxu0 %v2638_v49  ;;  %v2713_v49 = vld [vmem:[%s3016_s3 + $0xa0] sm:$0xff]  }
  0xae   :  { %1516 = vmatprep.subr.bf16.mxu1 %v2635_v48  ;;  %v2712_v48 = vld [vmem:[%s3016_s3 + $0xe0] sm:$0xff]  }
  0xb0   :  { %1480 = vmatpush2.bf16.msra.mxu0 %v2636_v51 }
  0xb1   :  { %1517 = vmatpush1.bf16.msra.mxu1 %v2633_v50  ;;  %1481 = vmatprep.subr.bf16.mxu0 %v2644_v54 }
  0xb2   :  { %1518 = vmatprep.subr.bf16.mxu1 %v2641_v53 }
  0xb4   :  { %1482 = vmatpush2.bf16.msra.mxu0 %v2642_v56  ;;  %v2714_v56 = vld [vmem:[%s3016_s3 + $0xd8] sm:$0xff]  }
  0xb5   :  { %1519 = vmatpush1.bf16.msra.mxu1 %v2639_v55  ;;  %1483 = vmatprep.subr.bf16.mxu0 %v2650_v58 }
  0xb6   :  { %1520 = vmatprep.subr.bf16.mxu1 %v2647_v57  ;;  %v2715_v57 = vld [vmem:[%s3016_s3 + $0x98] sm:$0xff]  }
  0xb8   :  { %1484 = vmatpush2.bf16.msra.mxu0 %v2648_v60  ;;  %v2716_v60 = vld [vmem:[%s3016_s3 + $0xd0] sm:$0xff]  }
  0xb9   :  { %1521 = vmatpush2.bf16.msra.mxu1 %v2645_v59  ;;  %1485 = vmatprep.subr.bf16.mxu0 %v2656_v62 }
  0xba   :  { %1522 = vmatprep.subr.bf16.mxu1 %v2653_v61  ;;  %v2717_v61 = vld [vmem:[%s3016_s3 + $0x90] sm:$0xff]  }
  0xbc   :  { %1486 = vmatpush2.bf16.msra.mxu0 %v2654_v0  ;;  %v2719_v0 = vld [vmem:[%s3016_s3 + $0x88] sm:$0xff]  }
  0xbd   :  { %1523 = vmatpush2.bf16.msra.mxu1 %v2651_v63  ;;  %1487 = vmatprep.subr.bf16.mxu0 %v2662_v2  ;;  %v2718_v63 = vld [vmem:[%s3016_s3 + $0xc8] sm:$0xff]   ;;  %v2721_v2 = vld [vmem:[%s3016_s3 + $0x80] sm:$0xff]  }
  0xbe   :  { %1524 = vmatprep.subr.bf16.mxu1 %v2659_v1  ;;  %v2720_v1 = vld [vmem:[%s3016_s3 + $0xc0] sm:$0xff]  }
  0xc0   :  { %1488 = vmatpush2.bf16.msra.mxu0 %v2660_v4 }
  0xc1   :  { %1525 = vmatpush2.bf16.msra.mxu1 %v2657_v3  ;;  %1489 = vmatprep.subr.bf16.mxu0 %v2668_v6  ;;  %v254_v3 = vlaneseq  ;;  %v252_v6 = vld [vmem:[%s3015_s2] sm:$0xf] }
  0xc2   :  { %1526 = vmatprep.subr.bf16.mxu1 %v2665_v5 }
  0xc3   :  { %v255_v4 = vshrl.u32 %v254_v3, 7 }
  0xc4   :  { %1490 = vmatpush2.bf16.msra.mxu0 %v2666_v10 }
  0xc5   :  { %1527 = vmatpush2.bf16.msra.mxu1 %v2663_v7  ;;  %1491 = vmatprep.subr.bf16.mxu0 %v2674_v12  ;;  %v256_v5 = vsub.s32 0, %v255_v4  ;;  %v260_v7 = vsub.s32 1, %v255_v4 }
  0xc6   :  { %1528 = vmatprep.subr.bf16.mxu1 %v2671_v11 }
  0xc7   :  { %v257_v10 = vrot.slane %v252_v6, %v256_v5  ;;  %v261_v11 = vrot.slane %v252_v6, %v260_v7 }
  0xc8   :  { %1492 = vmatpush2.bf16.msra.mxu0 %v2672_v14 }
  0xc9   :  { %1529 = vmatpush2.bf16.msra.mxu1 %v2669_v13  ;;  %1493 = vmatprep.subr.bf16.mxu0 %v2680_v17 }
  0xca   :  { %1530 = vmatprep.subr.bf16.mxu1 %v2677_v15 }
  0xcc   :  { %1494 = vmatpush2.bf16.msra.mxu0 %v2678_v21 }
  0xcd   :  { %1531 = vmatpush2.bf16.msra.mxu1 %v2675_v18  ;;  %2316 = vmatprep.subr.bf16.mxu0 %v2690_v23 }
  0xce   :  { %1532 = vmatprep.subr.bf16.mxu1 %v2683_v22 }
  0xcf   :  { %1496 = vmatmul.mubr.bf16.vlgmr.msra.gmra.mxu0 %v2848_v9  ;;  %v2695_v9 = vld [vmem:[%s3016_s3 + $0x28] sm:$0xff]  }
  0xd0   :  { %2317 = vmatpush3.bf16.msra.mxu0 %v2691_v25 }
  0xd1   :  { %1533 = vmatpush2.bf16.msra.mxu1 %v2681_v24  ;;  %2318 = vmatprep.subr.bf16.mxu0 %v2692_v27 }
  0xd2   :  { %1534 = vmatprep.subr.bf16.mxu1 %v2686_v26 }
  0xd4   :  { %2319 = vmatpush3.bf16.msra.mxu0 %v2693_v29 }
  0xd5   :  { %1535 = vmatpush2.bf16.msra.mxu1 %v2684_v28  ;;  %2320 = vmatprep.subr.bf16.mxu0 %v2694_v31 }
  0xd6   :  { %1559 = vmatprep.subr.bf16.mxu1 %v2689_v30 }
  0xd8   :  { %1537 = vmatmul.mubr.bf16.vlgmr.msra.gmra.mxu1 %v2870_v20  ;;  %2321 = vmatpush3.bf16.msra.mxu0 %v2695_v9  ;;  %v2706_v20 = vld [vmem:[%s3016_s3 + $0xf8] sm:$0xff]  }
  0xd9   :  { %1560 = vmatpush1.bf16.msra.mxu1 %v2687_v32  ;;  %1577 = vmatprep.mubr.bf16.mxu1 %v2781_v16  ;;  %v2707_v16 = vld [vmem:[%s3016_s3 + $0xb8] sm:$0xff]  }
  0xda   :  { %2322 = vmatprep.subr.bf16.mxu0 %v2696_v33  ;;  %2338 = vmatprep.subr.bf16.mxu1 %v2706_v20 }
  0xdc   :  { %2323 = vmatpush3.bf16.msra.mxu0 %v2697_v34 }
  0xdd   :  { %2324 = vmatprep.subr.bf16.mxu0 %v2698_v35 }
  0xe0   :  { %2273 = vmatmul.mubr.msk.bf16.vlgmr.msra.gmra.mxu1 %vm1254_vm0, %v2856_v19  ;;  %2325 = vmatpush3.bf16.msra.mxu0 %v2699_v37  ;;  %v2703_v19 = vld [vmem:[%s3016_s3 + $0x8] sm:$0xff]   ;;  %v264_v37 = vsub.s32 2, %v255_v4 }
  0xe1   :  { %2339 = vmatpush3.bf16.msra.mxu1 %v2707_v16  ;;  %2326 = vmatprep.subr.bf16.mxu0 %v2700_v52  ;;  %v268_v16 = vsub.s32 3, %v255_v4 }
  0xe2   :  { %2340 = vmatprep.subr.bf16.mxu1 %v2708_v38  ;;  %v265_v52 = vrot.slane %v252_v6, %v264_v37 }
  0xe4   :  { %2327 = vmatpush3.bf16.msra.mxu0 %v2701_v40  ;;  %v269_v40 = vrot.slane %v252_v6, %v268_v16 }
  0xe5   :  { %2341 = vmatpush3.bf16.msra.mxu1 %v2709_v39  ;;  %2328 = vmatprep.subr.bf16.mxu0 %v2702_v41 }
  0xe6   :  { %2342 = vmatprep.subr.bf16.mxu1 %v2710_v45 }
  0xe8   :  { %2329 = vmatpush3.bf16.msra.mxu0 %v2703_v19 }
  0xe9   :  { %2330 = vmatprep.subr.bf16.mxu0 %v2704_v42  ;;  %2343 = vmatpush3.bf16.msra.mxu1 %v2711_v46 }
  0xea   :  { %2344 = vmatprep.subr.bf16.mxu1 %v2712_v48 }
  0xec   :  { %2331 = vmatpush3.bf16.msra.mxu0 %v2705_v8 }
  0xed   :  { %2345 = vmatpush3.bf16.msra.mxu1 %v2713_v49 }
  0xee   :  { %2346 = vmatprep.subr.bf16.mxu1 %v2714_v56  ;;  %v2723_v56 = vld [vmem:[%s3018_s5 + $0x30] sm:$0xff]  }
  0xf1   :  { %2347 = vmatpush3.bf16.msra.mxu1 %v2715_v57 }
  0xf2   :  { %2348 = vmatprep.subr.bf16.mxu1 %v2716_v60 }
  0xf5   :  { %2349 = vmatpush3.bf16.msra.mxu1 %v2717_v61  ;;  %v2724_v61 = vld [vmem:[%s3018_s5 + $0x28] sm:$0xff]  }
  0xf6   :  { %2350 = vmatprep.subr.bf16.mxu1 %v2718_v63  ;;  %v2726_v63 = vld [vmem:[%s3018_s5 + $0x18] sm:$0xff]  }
  0xf9   :  { %2351 = vmatpush3.bf16.msra.mxu1 %v2719_v0  ;;  %v2727_v0 = vld [vmem:[%s3018_s5 + $0x10] sm:$0xff]  }
  0xfa   :  { %2352 = vmatprep.subr.bf16.mxu1 %v2720_v1  ;;  %v2728_v1 = vld [vmem:[%s3018_s5 + $0x8] sm:$0xff]  }
  0xfd   :  { %2353 = vmatpush3.bf16.msra.mxu1 %v2721_v2  ;;  %v2729_v2 = vld [vmem:[%s3018_s5] sm:$0xff]  }
 0x10f   :  { %v1292_v43 = vpop.f32.mrf.mxu0 }
 0x110   :  { %v1333_v44 = vpop.f32.mrf.mxu1  ;;  %v1293_v12 = vadd.f32 %v1292_v43, %v257_v10  ;;  %v2274_v10 = vld [vmem:[%s3017_s4] ss:$0 sm:$0xff]  ;;  %s2784_s4 = smov [#allocation5]  }
 0x111   :  { %v1294_v36 = vpop.f32.mrf.mxu0  ;;  %s2067_s28 = sshll.u32 %s2784_s4, 4  ;;  %s2068_s28 = int_to_ptr.vmem [resolvable:$true] %s2067_s28 }
 0x112   :  { %v1335_v47 = vpop.f32.mrf.mxu1  ;;  %v1295_v13 = vadd.f32 %v1294_v36, %v261_v11  ;;  %v1334_v14 = vadd.f32 %v1333_v44, %v1293_v12  ;;  %p2759_p6 = scmp.lt.s32.totalorder %s2068_s28, %s2068_s28 }
 0x113   :  { %v1296_v51 = vpop.f32.mrf.mxu0 }
 0x114   :  { %v1337_v50 = vpop.f32.mrf.mxu1  ;;  %v1336_v17 = vadd.f32 %v1335_v47, %v1295_v13 }
 0x115   :  { %v1297_v54 = vpop.f32.mrf.mxu0  ;;  %v2722_v50 = vld [vmem:[%s3018_s5 + $0x38] sm:$0xff]  }
 0x116   :  { %v1338_v53 = vpop.f32.mrf.mxu1 }
 0x117   :  { %v2782_v53 = vmov 0.0  }
 0x118   :  { %v1415_v55 = vpop.f32.mrf.mxu1  ;;  %2369 = vmatprep.subr.bf16.mxu0 %v2782_v53 }
 0x11a   :  { %v1417_v58 = vpop.f32.mrf.mxu1 }
 0x11c   :  { %v1419_v59 = vpop.f32.mrf.mxu1 }
 0x11e   :  { %v1420_v62 = vpop.f32.mrf.mxu1 }
 0x11f   :  { %v2725_v62 = vld [vmem:[%s3018_s5 + $0x20] sm:$0xff]  }
 0x14f   :  { %v1374_v15 = vpop.f32.mrf.mxu0 }
 0x150   :  { %v1375_v18 = vadd.f32 %v1374_v15, %v1334_v14 }
 0x151   :  { %v1376_v21 = vpop.f32.mrf.mxu0 }
 0x152   :  { %v1416_v22 = vadd.f32 %v1415_v55, %v1375_v18  ;;  %v1377_v23 = vadd.f32 %v1376_v21, %v1336_v17 }
 0x153   :  { %v1378_v24 = vpop.f32.mrf.mxu0 }
 0x154   :  { %v1418_v25 = vadd.f32 %v1417_v58, %v1377_v23  ;;  %v1586_v26 = vmax.f32 %v1416_v22, 0.0  ;;  %v2307_v23 = vld [vmem:[%s3019_s6] ss:$0 sm:$0xff]  ;;  %s2754_s6 = scalar_lea.vmem %s2068_s28, 128 }
 0x155   :  { %v1379_v27 = vpop.f32.mrf.mxu0  ;;  %p2755_p5 = scmp.ne.s32.totalorder %s2068_s28, %s2754_s6  ;;  %p2760_p7 = scmp.lt.s32.totalorder %s2754_s6, %s2754_s6 }
 0x156   :  { %v1587_v28 = vmax.f32 %v1418_v25, 0.0  ;;  %v1590_v31 = vpack.c.bf16 %v1586_v26, %v1586_v26 }
 0x157   :  { %p2761_p8 = por %p2760_p7, %p2759_p6 }
 0x158   :  { %v1456_v29 = vpop.f32.mrf.mxu1  ;;  %v1591_v30 = vpack.c.bf16 %v1587_v28, %v1587_v28 }
 0x159   :  { %v1457_v19 = vadd.f32 %v1456_v29, %v265_v52  ;;  %p2762_p9 = pnand %p2761_p8, %p2755_p5 }
 0x15a   :  { %v1458_v32 = vpop.f32.mrf.mxu1  ;;  %1889 = vmatprep.mubr.bf16.mxu0 %v1591_v30 }
 0x15b   :  { %1890 = vmatmul.mubr.bf16.vlgmr.msra.gmra.mxu0 %v1590_v31  ;;  %v1459_v8 = vadd.f32 %v1458_v32, %v269_v40 }
 0x15c   :  { %v1460_v9 = vpop.f32.mrf.mxu1  ;;  %2370 = vmatpush3.bf16.msra.mxu0 %v2722_v50  ;;  %2385 = vmatprep.mubr.msk.bf16.mxu0 %vm2783_vm1, %v2782_v53 }
 0x15d   :  { %2371 = vmatprep.subr.bf16.mxu0 %v2782_v53 }
 0x15e   :  { %v1461_v33 = vpop.f32.mrf.mxu1 }
 0x160   :  { %2372 = vmatpush3.bf16.msra.mxu0 %v2723_v56 }
 0x161   :  { %2373 = vmatprep.subr.bf16.mxu0 %v2782_v53 }
 0x164   :  { %2374 = vmatpush3.bf16.msra.mxu0 %v2724_v61 }
 0x165   :  { %2375 = vmatprep.subr.bf16.mxu0 %v2782_v53 }
 0x168   :  { %2376 = vmatpush3.bf16.msra.mxu0 %v2725_v62 }
 0x169   :  { %2377 = vmatprep.subr.bf16.mxu0 %v2782_v53 }
 0x16c   :  { %2378 = vmatpush3.bf16.msra.mxu0 %v2726_v63 }
 0x16d   :  { %2379 = vmatprep.subr.bf16.mxu0 %v2782_v53 }
 0x170   :  { %2380 = vmatpush3.bf16.msra.mxu0 %v2727_v0 }
 0x171   :  { %2381 = vmatprep.subr.bf16.mxu0 %v2782_v53 }
 0x174   :  { %2382 = vmatpush3.bf16.msra.mxu0 %v2728_v1 }
 0x175   :  { %2383 = vmatprep.subr.bf16.mxu0 %v2782_v53 }
 0x178   :  { %2384 = vmatpush3.bf16.msra.mxu0 %v2729_v2 }
 0x18f   :  { %v1497_v34 = vpop.f32.mrf.mxu0 }
 0x190   :  { %v1498_v43 = vadd.f32 %v1497_v34, %v1457_v19 }
 0x191   :  { %v1499_v35 = vpop.f32.mrf.mxu0 }
 0x192   :  { %v1500_v45 = vadd.f32 %v1499_v35, %v1459_v8 }
 0x193   :  { %v1501_v20 = vpop.f32.mrf.mxu0 }
 0x195   :  { %v1502_v38 = vpop.f32.mrf.mxu0 }
 0x198   :  { %v1538_v39 = vpop.f32.mrf.mxu1 }
 0x199   :  { %v1539_v46 = vadd.f32 %v1538_v39, %v1498_v43 }
 0x19a   :  { %v1540_v41 = vpop.f32.mrf.mxu1 }
 0x19b   :  { %v1541_v47 = vadd.f32 %v1540_v41, %v1500_v45 }
 0x19c   :  { %v1542_v42 = vpop.f32.mrf.mxu1 }
 0x19e   :  { %v1543_v44 = vpop.f32.mrf.mxu1 }
 0x1a0   :  { %v1579_v36 = vpop.f32.mrf.mxu1 }
 0x1a1   :  { %v1580_v48 = vadd.f32 %v1579_v36, %v1539_v46 }
 0x1a2   :  { %v1581_v49 = vpop.f32.mrf.mxu1 }
 0x1a3   :  { %v1582_v51 = vadd.f32 %v1581_v49, %v1541_v47  ;;  %v1588_v54 = vmax.f32 %v1580_v48, 0.0 }
 0x1a4   :  { %v1583_v55 = vpop.f32.mrf.mxu1 }
 0x1a5   :  { %v1589_v57 = vmax.f32 %v1582_v51, 0.0  ;;  %v1592_v60 = vpack.c.bf16 %v1588_v54, %v1588_v54 }
 0x1a6   :  { %v1584_v58 = vpop.f32.mrf.mxu1 }
 0x1a7   :  { %v1593_v59 = vpack.c.bf16 %v1589_v57, %v1589_v57 }
 0x1a9   :  { %1929 = vmatprep.mubr.bf16.mxu1 %v1593_v59 }
 0x1aa   :  { %1930 = vmatmul.mubr.bf16.vlgmr.msra.gmra.mxu1 %v1592_v60 }
 0x21b   :  { %v2332_v3 = vpop.f32.mrf.mxu0 }
 0x21d   :  { %v2333_v4 = vpop.f32.mrf.mxu0 }
 0x21e   :  { %v2334_v5 = vadd.f32 %v2333_v4, %v2332_v3 }
 0x21f   :  { %v2335_v6 = vpop.f32.mrf.mxu0 }
 0x220   :  { %v1892_v13 = vadd.f32 %v2334_v5, %v2274_v10 }
 0x221   :  { %v2336_v7 = vpop.f32.mrf.mxu0 }
 0x26a   :  { %v2354_v11 = vpop.f32.mrf.mxu1 }
 0x26c   :  { %v2355_v12 = vpop.f32.mrf.mxu1 }
 0x26d   :  { %v2356_v14 = vadd.f32 %v2355_v12, %v2354_v11 }
 0x26e   :  { %v2357_v15 = vpop.f32.mrf.mxu1 }
 0x26f   :  { %v1932_v17 = vadd.f32 %v2356_v14, %v1892_v13 }
 0x270   :  { %v2358_v18 = vpop.f32.mrf.mxu1 }
 0x271   :  { %v1937_v21 = vmax.f32 %v1932_v17, 0.0 }
 0x273   :  { %v1938_v22 = vpack.c.bf16 %v1937_v21, %v1937_v21 }
 0x275   :  { %2386 = vmatmul.mubr.bf16.vlgmr.msra.gmra.mxu0 %v1938_v22 }
 0x335   :  { %v2044_v24 = vpop.f32.mrf.mxu0 }
 0x336   :  { %v2045_v25 = vadd.f32 %v2307_v23, %v2044_v24 }
 0x337   :  { %v2387_v26 = vpop.f32.mrf.mxu0 }
 0x338   :  { %2050 = vmax.xlane.f32.xlu0 %v2045_v25 }
 0x339   :  { %v2047_v27 = vpop.f32.mrf.mxu0 }
 0x33b   :  { %v2388_v28 = vpop.f32.mrf.mxu0 }
 0x3c1   :  { %v2051_v29 = vpop.xlane.xlu0 %2050 }
 0x3c2   :  { %v2052_v30 = vsub.f32 %v2045_v25, %v2051_v29 }
 0x3c4   :  { %v2053_v31 = vmul.f32 1.442695, %v2052_v30 }
 0x3c6   :  { %2730 = vpow2.f32 %v2053_v31 }
 0x3d3   :  { %v2731_v32 = vpop.eup %2730 }
 0x3d4   :  { %2055 = vadd.xlane.f32.xlu0 %v2731_v32 }
 0x45d   :  { %v2056_v9 = vpop.xlane.xlu0 %2055 }
 0x45e   :  { %2732 = vlog2.f32 %v2056_v9 }
 0x46b   :  { %v2733_v33 = vpop.eup %2732 }
 0x46c   :  { %v2058_v34 = vmul.f32 0.6931472, %v2733_v33 }
 0x46e   :  { %v2059_v35 = vsub.f32 %v2052_v30, %v2058_v34 }
 0x470   :  { %2060 = vst [vmem:[#allocation5] sm:$0xff] %v2059_v35 }
 0x471   :  { %2765 = shalt.err (!%p2762_p9)
}
 0x472   :  { %2070 = dma.vmem_to_hbm [thread:$0]  %s2068_s28, 128, %s3020_s7, [#allocation4]  }
 0x473   :  { %2776 = dma.done.wait [#allocation4], 128  }
 0x474   :  { %2777 = vsyncadd [#allocation4], 4294967168 }
 0x475   :  { %2074 = vsyncpa [#allocation3], 1 }
 0x476   :  { %2075 = vsyncpa [#allocation4], 1 }

</bundles_post_ra>
